<compile_context>
chip_gen: v7x
topology: tpu7x:2x2x1
jax: 0.10.0
libtpu: 0.0.40
codegen_flags: <defaults>
</compile_context>

<pallas_src>
import functools
import math

import jax
import jax.numpy as jnp
from jax.experimental import pallas as pl
from jax.experimental.pallas import tpu as pltpu


# ---------------------------------------------------------------------------
# Kernels
# ---------------------------------------------------------------------------

def _stats_kernel(x_ref, w_ref, sum_ref, sq_ref):
    """Layer-0 only: per-(batch, n-tile) partial per-channel sum / sumsq of W@x."""
    x = x_ref[...].astype(jnp.bfloat16)                               # (Cin, nt)
    y = jnp.dot(w_ref[...], x, preferred_element_type=jnp.float32)    # (Cout, nt)
    sum_ref[...] = jnp.sum(y, axis=1, keepdims=True)
    sq_ref[...] = jnp.sum(y * y, axis=1, keepdims=True)


def _norm_last_kernel(x_ref, w_ref, scale_ref, shift_ref, o_ref):
    """Last layer: y = W @ x, BN affine (precomputed scale/shift), ReLU."""
    x = x_ref[...].astype(jnp.bfloat16)
    y = jnp.dot(w_ref[...], x, preferred_element_type=jnp.float32)
    h = jnp.maximum(y * scale_ref[...] + shift_ref[...], 0.0)
    o_ref[...] = h.astype(o_ref.dtype)          # padded columns cropped by wrapper


def _norm_fused_kernel(x_ref, w_ref, scale_ref, shift_ref, wn_ref,
                       o_ref, nsum_ref, nsq_ref, *, nt, n_valid, has_pad):
    """Intermediate layer: conv + BN affine + ReLU for this layer AND the
    partial per-channel stats of the *next* layer's pre-activation, computed
    on the tile that is already resident in VMEM (cross-layer stats fusion)."""
    x = x_ref[...].astype(jnp.bfloat16)                               # (Cin, nt)
    y = jnp.dot(w_ref[...], x, preferred_element_type=jnp.float32)    # (Cout, nt)
    h = jnp.maximum(y * scale_ref[...] + shift_ref[...], 0.0)
    if has_pad:
        # Zero padded columns so the next layer's stats (and everything
        # downstream) see exact zeros there (W @ 0 = 0, no conv bias).
        n = pl.program_id(1)
        col = n * nt + jax.lax.broadcasted_iota(jnp.int32, (1, nt), 1)
        h = jnp.where(col < n_valid, h, 0.0)
    h_bf = h.astype(jnp.bfloat16)
    o_ref[...] = h_bf
    # Next layer's pre-activation on the freshly produced tile -> its stats
    # come for free; the next layer then needs only a single normalize pass.
    yn = jnp.dot(wn_ref[...], h_bf, preferred_element_type=jnp.float32)
    nsum_ref[...] = jnp.sum(yn, axis=1, keepdims=True)
    nsq_ref[...] = jnp.sum(yn * yn, axis=1, keepdims=True)


# ---------------------------------------------------------------------------
# pallas_call wrappers
# ---------------------------------------------------------------------------

def _compiler_params(vmem_limit):
    return pltpu.CompilerParams(
        dimension_semantics=("parallel", "parallel"),
        vmem_limit_bytes=int(vmem_limit),
    )


def _stats_call(x, w_bf16, *, nt, vmem_limit):
    B, Cin, Npad = x.shape
    Cout = w_bf16.shape[0]
    ntiles = Npad // nt
    return pl.pallas_call(
        _stats_kernel,
        out_shape=(jax.ShapeDtypeStruct((B, ntiles, Cout, 1), jnp.float32),
                   jax.ShapeDtypeStruct((B, ntiles, Cout, 1), jnp.float32)),
        grid=(B, ntiles),
        in_specs=[
            pl.BlockSpec((None, Cin, nt), lambda b, n: (b, 0, n)),
            pl.BlockSpec((Cout, Cin), lambda b, n: (0, 0)),
        ],
        out_specs=[
            pl.BlockSpec((None, None, Cout, 1), lambda b, n: (b, n, 0, 0)),
            pl.BlockSpec((None, None, Cout, 1), lambda b, n: (b, n, 0, 0)),
        ],
        compiler_params=_compiler_params(vmem_limit),
    )(x, w_bf16)


def _norm_last_call(x, w_bf16, scale, shift, *, nt, vmem_limit, out_dtype):
    B, Cin, Npad = x.shape
    Cout = w_bf16.shape[0]
    ntiles = Npad // nt
    return pl.pallas_call(
        _norm_last_kernel,
        out_shape=jax.ShapeDtypeStruct((B, Cout, Npad), out_dtype),
        grid=(B, ntiles),
        in_specs=[
            pl.BlockSpec((None, Cin, nt), lambda b, n: (b, 0, n)),
            pl.BlockSpec((Cout, Cin), lambda b, n: (0, 0)),
            pl.BlockSpec((Cout, 1), lambda b, n: (0, 0)),
            pl.BlockSpec((Cout, 1), lambda b, n: (0, 0)),
        ],
        out_specs=pl.BlockSpec((None, Cout, nt), lambda b, n: (b, 0, n)),
        compiler_params=_compiler_params(vmem_limit),
    )(x, w_bf16, scale, shift)


def _norm_fused_call(x, w_bf16, scale, shift, w_next_bf16, *,
                     nt, n_valid, vmem_limit):
    B, Cin, Npad = x.shape
    Cout = w_bf16.shape[0]
    Cnext = w_next_bf16.shape[0]
    ntiles = Npad // nt
    kernel = functools.partial(_norm_fused_kernel, nt=nt, n_valid=n_valid,
                               has_pad=(Npad != n_valid))
    return pl.pallas_call(
        kernel,
        out_shape=(jax.ShapeDtypeStruct((B, Cout, Npad), jnp.bfloat16),
                   jax.ShapeDtypeStruct((B, ntiles, Cnext, 1), jnp.float32),
                   jax.ShapeDtypeStruct((B, ntiles, Cnext, 1), jnp.float32)),
        grid=(B, ntiles),
        in_specs=[
            pl.BlockSpec((None, Cin, nt), lambda b, n: (b, 0, n)),
            pl.BlockSpec((Cout, Cin), lambda b, n: (0, 0)),
            pl.BlockSpec((Cout, 1), lambda b, n: (0, 0)),
            pl.BlockSpec((Cout, 1), lambda b, n: (0, 0)),
            pl.BlockSpec((Cnext, Cout), lambda b, n: (0, 0)),
        ],
        out_specs=[
            pl.BlockSpec((None, Cout, nt), lambda b, n: (b, 0, n)),
            pl.BlockSpec((None, None, Cnext, 1), lambda b, n: (b, n, 0, 0)),
            pl.BlockSpec((None, None, Cnext, 1), lambda b, n: (b, n, 0, 0)),
        ],
        compiler_params=_compiler_params(vmem_limit),
    )(x, w_bf16, scale, shift, w_next_bf16)


# ---------------------------------------------------------------------------
# Tile / VMEM planning
# ---------------------------------------------------------------------------

def _round_up(x, m):
    return ((x + m - 1) // m) * m


def _vmem_budget_bytes():
    try:
        info = pltpu.get_tpu_info()
        cap = int(getattr(info, "vmem_capacity_bytes", 0) or 0)
        if cap > 0:
            return (cap * 3) // 4         # ~48 MiB on v7x, ~96 MiB on v5e/v6e
    except Exception:
        pass
    return 48 * 1024 * 1024               # safe on every generation


def _plan_tiles(B, N, widths):
    """Pick one lane tile nt (multiple of 128, shared by all layers so the
    padded activations can be chained without re-padding) and a VMEM limit,
    from the worst per-layer working-set estimate."""
    budget = _vmem_budget_bytes()
    npad128 = _round_up(max(N, 1), 128)
    n_layers = len(widths) - 1

    def need(nt):
        worst = 0
        for i in range(1, len(widths)):
            cin, cout = widths[i - 1], widths[i]
            cnext = widths[i + 1] if i + 1 <= n_layers else 0
            in_b = 4 if i == 1 else 2          # first-layer input is f32
            out_b = 4 if i == n_layers else 2  # last-layer output is f32
            est = (2 * cin * nt * in_b         # x tile, double-buffered
                   + 2 * cout * nt * out_b     # out tile, double-buffered
                   + 3 * cout * nt * 4         # f32 y / h temporaries
                   + 2 * cnext * nt * 4        # fused next-layer pre-activation
                   + 4 * (cout * cin + cnext * cout)  # bf16 weights (buffered)
                   + (1 << 20))                # partial-stat blocks + headroom
            worst = max(worst, est)
        return worst

    nt = 128
    for cand in (4096, 2048, 1024, 512, 256, 128):
        if npad128 % cand == 0 and need(cand) <= budget:
            nt = cand
            break
    npad = _round_up(max(N, 1), nt)
    return nt, npad, int(budget)


# ---------------------------------------------------------------------------
# Parameters & forward pass
# ---------------------------------------------------------------------------

def init_mlpnet_params(key, nch_input, nch_layers):
    """Parameter shapes mirroring MLPNet(b_shared=True).

    Conv1d(last, outp, 1).weight is (outp, last, 1) -> stored as (outp, last),
    exactly the matmul orientation the kernels use.  The conv bias is omitted:
    training-mode BatchNorm1d subtracts the per-channel batch mean right after
    the conv, so a per-channel bias cancels exactly.  BN: gamma=1, beta=0.
    """
    params = []
    last = nch_input
    for outp in nch_layers:
        key, kw = jax.random.split(key)
        bound = 1.0 / math.sqrt(last)
        w = jax.random.uniform(kw, (outp, last), jnp.float32, -bound, bound)
        gamma = jnp.ones((outp, 1), jnp.float32)
        beta = jnp.zeros((outp, 1), jnp.float32)
        params.append((w, gamma, beta))
        last = outp
    return params


def mlpnet_forward(x_ncw, params, eps=1e-5):
    """x_ncw: (B, C_in, N) float32 -> (B, C_out_last, N) float32 (NCW)."""
    B, C0, N = x_ncw.shape
    n_layers = len(params)
    widths = [C0] + [w.shape[0] for (w, _, _) in params]
    nt, npad, vmem_limit = _plan_tiles(B, N, widths)
    inv_m = 1.0 / float(B * N)            # true element count (padding excluded)

    h = x_ncw
    if npad != N:
        # Zero padding -> padded columns contribute exactly 0 to every layer's
        # stats (no conv bias; intermediate layers re-zero them in-kernel).
        h = jnp.pad(h, ((0, 0), (0, 0), (0, npad - N)))

    w_bf = [w.astype(jnp.bfloat16) for (w, _, _) in params]

    # Layer-0 stats: standalone fully-parallel pass over the (small-Cin) input.
    psum, psq = _stats_call(h, w_bf[0], nt=nt, vmem_limit=vmem_limit)

    for i, (_, gamma, beta) in enumerate(params):
        # Finalize train-mode BN stats (tiny f32 math in plain XLA).
        s = jnp.sum(psum, axis=(0, 1))                        # (Cout, 1)
        sq = jnp.sum(psq, axis=(0, 1))
        mean = s * inv_m
        var = jnp.maximum(sq * inv_m - mean * mean, 0.0)
        rstd = jax.lax.rsqrt(var + eps)
        scale = gamma * rstd                                  # gamma / std
        shift = beta - mean * scale

        if i == n_layers - 1:
            h = _norm_last_call(h, w_bf[i], scale, shift, nt=nt,
                                vmem_limit=vmem_limit, out_dtype=jnp.float32)
        else:
            h, psum, psq = _norm_fused_call(h, w_bf[i], scale, shift,
                                            w_bf[i + 1], nt=nt, n_valid=N,
                                            vmem_limit=vmem_limit)

    return h[:, :, :N] if npad != N else h


def _reference_forward(x_ncw, params, eps=1e-5):
    """Pure-JAX reference with the same bf16 matmul / activation casts."""
    h = x_ncw
    n_layers = len(params)
    for i, (w, gamma, beta) in enumerate(params):
        y = jnp.einsum("oc,bcn->bon", w.astype(jnp.bfloat16),
                       h.astype(jnp.bfloat16),
                       preferred_element_type=jnp.float32)
        mean = jnp.mean(y, axis=(0, 2), keepdims=True)
        var = jnp.mean(jnp.square(y - mean), axis=(0, 2), keepdims=True)
        out = jnp.maximum((y - mean) * jax.lax.rsqrt(var + eps)
                          * gamma[None] + beta[None], 0.0)
        h = out.astype(jnp.float32 if i == n_layers - 1 else jnp.bfloat16)
    return h


if __name__ == "__main__":
    key = jax.random.PRNGKey(0)
    kx, kp = jax.random.split(key)

    B, C_IN, N = 2, 4, 16
    NCH_LAYERS = [32, 64]

    x = jax.random.normal(kx, (B, C_IN, N), dtype=jnp.float32)
    params = init_mlpnet_params(kp, C_IN, NCH_LAYERS)

    fwd = jax.jit(mlpnet_forward)
    out = fwd(x, params)
    jax.block_until_ready(out)

    assert out.shape == (B, NCH_LAYERS[-1], N), out.shape
    assert out.dtype == jnp.float32
    assert bool(jnp.all(out >= 0.0))            # ReLU output

    ref = _reference_forward(x, params)
    err = float(jnp.max(jnp.abs(out - ref)))
    assert err < 3e-2, err

    print("KERNEL_OK")
</pallas_src>

<mosaic_0001>
module attributes {stable_mosaic.version = 11 : i64} {
  func.func @_stats_kernel(%arg0: i32, %arg1: i32, %arg2: memref<1x4x128xf32, #tpu.memory_space<vmem>>, %arg3: memref<32x4xbf16, #tpu.memory_space<vmem>>, %arg4: memref<1x1x32x1xf32, #tpu.memory_space<vmem>>, %arg5: memref<1x1x32x1xf32, #tpu.memory_space<vmem>>) attributes {dimension_semantics = [#tpu.dimension_semantics<parallel>, #tpu.dimension_semantics<parallel>], iteration_bounds = array<i64: 2, 1>, scalar_prefetch = 0 : i64, scratch_operands = 0 : i64, tpu.core_type = #tpu.core_type<tc>, window_params = [{transform_indices = @transform_0, window_bounds = array<i64: 1, 4, 128>}, {pipeline_mode = #tpu.pipeline_mode<synchronous>, transform_indices = @transform_1, window_bounds = array<i64: 32, 4>}, {transform_indices = @transform_2, window_bounds = array<i64: 1, 1, 32, 1>}, {transform_indices = @transform_3, window_bounds = array<i64: 1, 1, 32, 1>}]} {
    %c0 = arith.constant 0 : index
    %c0_0 = arith.constant 0 : index
    %c0_1 = arith.constant 0 : index
    %0 = vector.load %arg2[%c0, %c0_0, %c0_1] : memref<1x4x128xf32, #tpu.memory_space<vmem>>, vector<1x4x128xf32>
    %1 = vector.shape_cast %0 : vector<1x4x128xf32> to vector<4x128xf32>
    %2 = arith.truncf %1 : vector<4x128xf32> to vector<4x128xbf16>
    %c0_2 = arith.constant 0 : index
    %c0_3 = arith.constant 0 : index
    %3 = vector.load %arg3[%c0_2, %c0_3] : memref<32x4xbf16, #tpu.memory_space<vmem>>, vector<32x4xbf16>
    %cst = arith.constant dense<0.000000e+00> : vector<32x128xf32>
    %4 = tpu.matmul %3, %2, %cst {dimension_numbers = #tpu.dot_dimension_numbers<[1], [0], [0], [1], [0, 0, 1, 1], [], []>} : vector<32x4xbf16>, vector<4x128xbf16>, vector<32x128xf32> -> vector<32x128xf32>
    %cst_4 = arith.constant dense<0.000000e+00> : vector<32xf32>
    %5 = vector.multi_reduction <add>, %4, %cst_4 [1] : vector<32x128xf32> to vector<32xf32>
    %6 = vector.shape_cast %5 : vector<32xf32> to vector<32x1xf32>
    %c0_5 = arith.constant 0 : index
    %c0_6 = arith.constant 0 : index
    %c0_7 = arith.constant 0 : index
    %c0_8 = arith.constant 0 : index
    %7 = vector.load %arg4[%c0_5, %c0_6, %c0_7, %c0_8] : memref<1x1x32x1xf32, #tpu.memory_space<vmem>>, vector<1x1x32x1xf32>
    %8 = vector.shape_cast %7 : vector<1x1x32x1xf32> to vector<32x1xf32>
    %9 = vector.shape_cast %6 : vector<32x1xf32> to vector<1x1x32x1xf32>
    tpu.vector_store %arg4[%c0_5, %c0_6, %c0_7, %c0_8], %9 {strides = array<i32>} : memref<1x1x32x1xf32, #tpu.memory_space<vmem>>, vector<1x1x32x1xf32>,
    %10 = arith.mulf %4, %4 : vector<32x128xf32>
    %cst_9 = arith.constant dense<0.000000e+00> : vector<32xf32>
    %11 = vector.multi_reduction <add>, %10, %cst_9 [1] : vector<32x128xf32> to vector<32xf32>
    %12 = vector.shape_cast %11 : vector<32xf32> to vector<32x1xf32>
    %c0_10 = arith.constant 0 : index
    %c0_11 = arith.constant 0 : index
    %c0_12 = arith.constant 0 : index
    %c0_13 = arith.constant 0 : index
    %13 = vector.load %arg5[%c0_10, %c0_11, %c0_12, %c0_13] : memref<1x1x32x1xf32, #tpu.memory_space<vmem>>, vector<1x1x32x1xf32>
    %14 = vector.shape_cast %13 : vector<1x1x32x1xf32> to vector<32x1xf32>
    %15 = vector.shape_cast %12 : vector<32x1xf32> to vector<1x1x32x1xf32>
    tpu.vector_store %arg5[%c0_10, %c0_11, %c0_12, %c0_13], %15 {strides = array<i32>} : memref<1x1x32x1xf32, #tpu.memory_space<vmem>>, vector<1x1x32x1xf32>,
    return
  }
  func.func @transform_0(%arg0: i32, %arg1: i32) -> (i32, i32, i32) {
    %c0_i32 = arith.constant 0 : i32
    %c0_i32_0 = arith.constant 0 : i32
    return %arg0, %c0_i32, %arg1 : i32, i32, i32
  }
  func.func @transform_1(%arg0: i32, %arg1: i32) -> (i32, i32) {
    %c0_i32 = arith.constant 0 : i32
    %c0_i32_0 = arith.constant 0 : i32
    %c0_i32_1 = arith.constant 0 : i32
    return %c0_i32, %c0_i32_0 : i32, i32
  }
  func.func @transform_2(%arg0: i32, %arg1: i32) -> (i32, i32, i32, i32) {
    %c0_i32 = arith.constant 0 : i32
    %c0_i32_0 = arith.constant 0 : i32
    %c0_i32_1 = arith.constant 0 : i32
    return %arg0, %arg1, %c0_i32, %c0_i32_0 : i32, i32, i32, i32
  }
  func.func @transform_3(%arg0: i32, %arg1: i32) -> (i32, i32, i32, i32) {
    %c0_i32 = arith.constant 0 : i32
    %c0_i32_0 = arith.constant 0 : i32
    %c0_i32_1 = arith.constant 0 : i32
    return %arg0, %arg1, %c0_i32, %c0_i32_0 : i32, i32, i32, i32
  }
}

module attributes {stable_mosaic.version = 11 : i64} {
  func.func @_norm_fused_kernel(%arg0: i32, %arg1: i32, %arg2: memref<1x4x128xf32, #tpu.memory_space<vmem>>, %arg3: memref<32x4xbf16, #tpu.memory_space<vmem>>, %arg4: memref<32x1xf32, #tpu.memory_space<vmem>>, %arg5: memref<32x1xf32, #tpu.memory_space<vmem>>, %arg6: memref<64x32xbf16, #tpu.memory_space<vmem>>, %arg7: memref<1x32x128xbf16, #tpu.memory_space<vmem>>, %arg8: memref<1x1x64x1xf32, #tpu.memory_space<vmem>>, %arg9: memref<1x1x64x1xf32, #tpu.memory_space<vmem>>) attributes {dimension_semantics = [#tpu.dimension_semantics<parallel>, #tpu.dimension_semantics<parallel>], iteration_bounds = array<i64: 2, 1>, scalar_prefetch = 0 : i64, scratch_operands = 0 : i64, tpu.core_type = #tpu.core_type<tc>, window_params = [{transform_indices = @transform_0, window_bounds = array<i64: 1, 4, 128>}, {pipeline_mode = #tpu.pipeline_mode<synchronous>, transform_indices = @transform_1, window_bounds = array<i64: 32, 4>}, {pipeline_mode = #tpu.pipeline_mode<synchronous>, transform_indices = @transform_2, window_bounds = array<i64: 32, 1>}, {pipeline_mode = #tpu.pipeline_mode<synchronous>, transform_indices = @transform_3, window_bounds = array<i64: 32, 1>}, {pipeline_mode = #tpu.pipeline_mode<synchronous>, transform_indices = @transform_4, window_bounds = array<i64: 64, 32>}, {transform_indices = @transform_5, window_bounds = array<i64: 1, 32, 128>}, {transform_indices = @transform_6, window_bounds = array<i64: 1, 1, 64, 1>}, {transform_indices = @transform_7, window_bounds = array<i64: 1, 1, 64, 1>}]} {
    %c0 = arith.constant 0 : index
    %c0_0 = arith.constant 0 : index
    %c0_1 = arith.constant 0 : index
    %0 = vector.load %arg2[%c0, %c0_0, %c0_1] : memref<1x4x128xf32, #tpu.memory_space<vmem>>, vector<1x4x128xf32>
    %1 = vector.shape_cast %0 : vector<1x4x128xf32> to vector<4x128xf32>
    %2 = arith.truncf %1 : vector<4x128xf32> to vector<4x128xbf16>
    %c0_2 = arith.constant 0 : index
    %c0_3 = arith.constant 0 : index
    %3 = vector.load %arg3[%c0_2, %c0_3] : memref<32x4xbf16, #tpu.memory_space<vmem>>, vector<32x4xbf16>
    %cst = arith.constant dense<0.000000e+00> : vector<32x128xf32>
    %4 = tpu.matmul %3, %2, %cst {dimension_numbers = #tpu.dot_dimension_numbers<[1], [0], [0], [1], [0, 0, 1, 1], [], []>} : vector<32x4xbf16>, vector<4x128xbf16>, vector<32x128xf32> -> vector<32x128xf32>
    %c0_4 = arith.constant 0 : index
    %c0_5 = arith.constant 0 : index
    %5 = vector.load %arg4[%c0_4, %c0_5] : memref<32x1xf32, #tpu.memory_space<vmem>>, vector<32x1xf32>
    %6 = vector.broadcast %5 : vector<32x1xf32> to vector<32x128xf32>
    %7 = arith.mulf %4, %6 : vector<32x128xf32>
    %c0_6 = arith.constant 0 : index
    %c0_7 = arith.constant 0 : index
    %8 = vector.load %arg5[%c0_6, %c0_7] : memref<32x1xf32, #tpu.memory_space<vmem>>, vector<32x1xf32>
    %9 = vector.broadcast %8 : vector<32x1xf32> to vector<32x128xf32>
    %10 = arith.addf %7, %9 : vector<32x128xf32>
    %cst_8 = arith.constant 0.000000e+00 : f32
    %11 = vector.broadcast %cst_8 : f32 to vector<32x128xf32>
    %12 = arith.maximumf %10, %11 : vector<32x128xf32>
    %c128_i32 = arith.constant 128 : i32
    %13 = arith.muli %arg1, %c128_i32 : i32
    %14 = tpu.iota {dimensions = array<i32: 1>} : vector<1x128xi32>
    %15 = vector.broadcast %13 : i32 to vector<1x128xi32>
    %16 = arith.addi %15, %14 : vector<1x128xi32>
    %c16_i32 = arith.constant 16 : i32
    %17 = vector.broadcast %c16_i32 : i32 to vector<1x128xi32>
    %18 = arith.cmpi slt, %16, %17 : vector<1x128xi32>
    %cst_9 = arith.constant 0.000000e+00 : f32
    %19 = vector.shape_cast %18 : vector<1x128xi1> to vector<1x128xi1>
    %20 = vector.broadcast %19 : vector<1x128xi1> to vector<32x128xi1>
    %21 = vector.broadcast %cst_9 : f32 to vector<32x128xf32>
    %22 = arith.select %20, %12, %21 : vector<32x128xi1>, vector<32x128xf32>
    %23 = arith.truncf %22 : vector<32x128xf32> to vector<32x128xbf16>
    %c0_10 = arith.constant 0 : index
    %c0_11 = arith.constant 0 : index
    %c0_12 = arith.constant 0 : index
    %24 = vector.load %arg7[%c0_10, %c0_11, %c0_12] : memref<1x32x128xbf16, #tpu.memory_space<vmem>>, vector<1x32x128xbf16>
    %25 = vector.shape_cast %24 : vector<1x32x128xbf16> to vector<32x128xbf16>
    %26 = vector.shape_cast %23 : vector<32x128xbf16> to vector<1x32x128xbf16>
    tpu.vector_store %arg7[%c0_10, %c0_11, %c0_12], %26 {strides = array<i32>} : memref<1x32x128xbf16, #tpu.memory_space<vmem>>, vector<1x32x128xbf16>,
    %c0_13 = arith.constant 0 : index
    %c0_14 = arith.constant 0 : index
    %27 = vector.load %arg6[%c0_13, %c0_14] : memref<64x32xbf16, #tpu.memory_space<vmem>>, vector<64x32xbf16>
    %cst_15 = arith.constant dense<0.000000e+00> : vector<64x128xf32>
    %28 = tpu.matmul %27, %23, %cst_15 {dimension_numbers = #tpu.dot_dimension_numbers<[1], [0], [0], [1], [0, 0, 1, 1], [], []>} : vector<64x32xbf16>, vector<32x128xbf16>, vector<64x128xf32> -> vector<64x128xf32>
    %cst_16 = arith.constant dense<0.000000e+00> : vector<64xf32>
    %29 = vector.multi_reduction <add>, %28, %cst_16 [1] : vector<64x128xf32> to vector<64xf32>
    %30 = vector.shape_cast %29 : vector<64xf32> to vector<64x1xf32>
    %c0_17 = arith.constant 0 : index
    %c0_18 = arith.constant 0 : index
    %c0_19 = arith.constant 0 : index
    %c0_20 = arith.constant 0 : index
    %31 = vector.load %arg8[%c0_17, %c0_18, %c0_19, %c0_20] : memref<1x1x64x1xf32, #tpu.memory_space<vmem>>, vector<1x1x64x1xf32>
    %32 = vector.shape_cast %31 : vector<1x1x64x1xf32> to vector<64x1xf32>
    %33 = vector.shape_cast %30 : vector<64x1xf32> to vector<1x1x64x1xf32>
    tpu.vector_store %arg8[%c0_17, %c0_18, %c0_19, %c0_20], %33 {strides = array<i32>} : memref<1x1x64x1xf32, #tpu.memory_space<vmem>>, vector<1x1x64x1xf32>,
    %34 = arith.mulf %28, %28 : vector<64x128xf32>
    %cst_21 = arith.constant dense<0.000000e+00> : vector<64xf32>
    %35 = vector.multi_reduction <add>, %34, %cst_21 [1] : vector<64x128xf32> to vector<64xf32>
    %36 = vector.shape_cast %35 : vector<64xf32> to vector<64x1xf32>
    %c0_22 = arith.constant 0 : index
    %c0_23 = arith.constant 0 : index
    %c0_24 = arith.constant 0 : index
    %c0_25 = arith.constant 0 : index
    %37 = vector.load %arg9[%c0_22, %c0_23, %c0_24, %c0_25] : memref<1x1x64x1xf32, #tpu.memory_space<vmem>>, vector<1x1x64x1xf32>
    %38 = vector.shape_cast %37 : vector<1x1x64x1xf32> to vector<64x1xf32>
    %39 = vector.shape_cast %36 : vector<64x1xf32> to vector<1x1x64x1xf32>
    tpu.vector_store %arg9[%c0_22, %c0_23, %c0_24, %c0_25], %39 {strides = array<i32>} : memref<1x1x64x1xf32, #tpu.memory_space<vmem>>, vector<1x1x64x1xf32>,
    return
  }
  func.func @transform_0(%arg0: i32, %arg1: i32) -> (i32, i32, i32) {
    %c0_i32 = arith.constant 0 : i32
    %c0_i32_0 = arith.constant 0 : i32
    return %arg0, %c0_i32, %arg1 : i32, i32, i32
  }
  func.func @transform_1(%arg0: i32, %arg1: i32) -> (i32, i32) {
    %c0_i32 = arith.constant 0 : i32
    %c0_i32_0 = arith.constant 0 : i32
    %c0_i32_1 = arith.constant 0 : i32
    return %c0_i32, %c0_i32_0 : i32, i32
  }
  func.func @transform_2(%arg0: i32, %arg1: i32) -> (i32, i32) {
    %c0_i32 = arith.constant 0 : i32
    %c0_i32_0 = arith.constant 0 : i32
    %c0_i32_1 = arith.constant 0 : i32
    return %c0_i32, %c0_i32_0 : i32, i32
  }
  func.func @transform_3(%arg0: i32, %arg1: i32) -> (i32, i32) {
    %c0_i32 = arith.constant 0 : i32
    %c0_i32_0 = arith.constant 0 : i32
    %c0_i32_1 = arith.constant 0 : i32
    return %c0_i32, %c0_i32_0 : i32, i32
  }
  func.func @transform_4(%arg0: i32, %arg1: i32) -> (i32, i32) {
    %c0_i32 = arith.constant 0 : i32
    %c0_i32_0 = arith.constant 0 : i32
    %c0_i32_1 = arith.constant 0 : i32
    return %c0_i32, %c0_i32_0 : i32, i32
  }
  func.func @transform_5(%arg0: i32, %arg1: i32) -> (i32, i32, i32) {
    %c0_i32 = arith.constant 0 : i32
    %c0_i32_0 = arith.constant 0 : i32
    return %arg0, %c0_i32, %arg1 : i32, i32, i32
  }
  func.func @transform_6(%arg0: i32, %arg1: i32) -> (i32, i32, i32, i32) {
    %c0_i32 = arith.constant 0 : i32
    %c0_i32_0 = arith.constant 0 : i32
    %c0_i32_1 = arith.constant 0 : i32
    return %arg0, %arg1, %c0_i32, %c0_i32_0 : i32, i32, i32, i32
  }
  func.func @transform_7(%arg0: i32, %arg1: i32) -> (i32, i32, i32, i32) {
    %c0_i32 = arith.constant 0 : i32
    %c0_i32_0 = arith.constant 0 : i32
    %c0_i32_1 = arith.constant 0 : i32
    return %arg0, %arg1, %c0_i32, %c0_i32_0 : i32, i32, i32, i32
  }
}

module attributes {stable_mosaic.version = 11 : i64} {
  func.func @_norm_last_kernel(%arg0: i32, %arg1: i32, %arg2: memref<1x32x128xbf16, #tpu.memory_space<vmem>>, %arg3: memref<64x32xbf16, #tpu.memory_space<vmem>>, %arg4: memref<64x1xf32, #tpu.memory_space<vmem>>, %arg5: memref<64x1xf32, #tpu.memory_space<vmem>>, %arg6: memref<1x64x128xf32, #tpu.memory_space<vmem>>) attributes {dimension_semantics = [#tpu.dimension_semantics<parallel>, #tpu.dimension_semantics<parallel>], iteration_bounds = array<i64: 2, 1>, scalar_prefetch = 0 : i64, scratch_operands = 0 : i64, tpu.core_type = #tpu.core_type<tc>, window_params = [{transform_indices = @transform_0, window_bounds = array<i64: 1, 32, 128>}, {pipeline_mode = #tpu.pipeline_mode<synchronous>, transform_indices = @transform_1, window_bounds = array<i64: 64, 32>}, {pipeline_mode = #tpu.pipeline_mode<synchronous>, transform_indices = @transform_2, window_bounds = array<i64: 64, 1>}, {pipeline_mode = #tpu.pipeline_mode<synchronous>, transform_indices = @transform_3, window_bounds = array<i64: 64, 1>}, {transform_indices = @transform_4, window_bounds = array<i64: 1, 64, 128>}]} {
    %c0 = arith.constant 0 : index
    %c0_0 = arith.constant 0 : index
    %c0_1 = arith.constant 0 : index
    %0 = vector.load %arg2[%c0, %c0_0, %c0_1] : memref<1x32x128xbf16, #tpu.memory_space<vmem>>, vector<1x32x128xbf16>
    %1 = vector.shape_cast %0 : vector<1x32x128xbf16> to vector<32x128xbf16>
    %c0_2 = arith.constant 0 : index
    %c0_3 = arith.constant 0 : index
    %2 = vector.load %arg3[%c0_2, %c0_3] : memref<64x32xbf16, #tpu.memory_space<vmem>>, vector<64x32xbf16>
    %cst = arith.constant dense<0.000000e+00> : vector<64x128xf32>
    %3 = tpu.matmul %2, %1, %cst {dimension_numbers = #tpu.dot_dimension_numbers<[1], [0], [0], [1], [0, 0, 1, 1], [], []>} : vector<64x32xbf16>, vector<32x128xbf16>, vector<64x128xf32> -> vector<64x128xf32>
    %c0_4 = arith.constant 0 : index
    %c0_5 = arith.constant 0 : index
    %4 = vector.load %arg4[%c0_4, %c0_5] : memref<64x1xf32, #tpu.memory_space<vmem>>, vector<64x1xf32>
    %5 = vector.broadcast %4 : vector<64x1xf32> to vector<64x128xf32>
    %6 = arith.mulf %3, %5 : vector<64x128xf32>
    %c0_6 = arith.constant 0 : index
    %c0_7 = arith.constant 0 : index
    %7 = vector.load %arg5[%c0_6, %c0_7] : memref<64x1xf32, #tpu.memory_space<vmem>>, vector<64x1xf32>
    %8 = vector.broadcast %7 : vector<64x1xf32> to vector<64x128xf32>
    %9 = arith.addf %6, %8 : vector<64x128xf32>
    %cst_8 = arith.constant 0.000000e+00 : f32
    %10 = vector.broadcast %cst_8 : f32 to vector<64x128xf32>
    %11 = arith.maximumf %9, %10 : vector<64x128xf32>
    %c0_9 = arith.constant 0 : index
    %c0_10 = arith.constant 0 : index
    %c0_11 = arith.constant 0 : index
    %12 = vector.load %arg6[%c0_9, %c0_10, %c0_11] : memref<1x64x128xf32, #tpu.memory_space<vmem>>, vector<1x64x128xf32>
    %13 = vector.shape_cast %12 : vector<1x64x128xf32> to vector<64x128xf32>
    %14 = vector.shape_cast %11 : vector<64x128xf32> to vector<1x64x128xf32>
    tpu.vector_store %arg6[%c0_9, %c0_10, %c0_11], %14 {strides = array<i32>} : memref<1x64x128xf32, #tpu.memory_space<vmem>>, vector<1x64x128xf32>,
    return
  }
  func.func @transform_0(%arg0: i32, %arg1: i32) -> (i32, i32, i32) {
    %c0_i32 = arith.constant 0 : i32
    %c0_i32_0 = arith.constant 0 : i32
    return %arg0, %c0_i32, %arg1 : i32, i32, i32
  }
  func.func @transform_1(%arg0: i32, %arg1: i32) -> (i32, i32) {
    %c0_i32 = arith.constant 0 : i32
    %c0_i32_0 = arith.constant 0 : i32
    %c0_i32_1 = arith.constant 0 : i32
    return %c0_i32, %c0_i32_0 : i32, i32
  }
  func.func @transform_2(%arg0: i32, %arg1: i32) -> (i32, i32) {
    %c0_i32 = arith.constant 0 : i32
    %c0_i32_0 = arith.constant 0 : i32
    %c0_i32_1 = arith.constant 0 : i32
    return %c0_i32, %c0_i32_0 : i32, i32
  }
  func.func @transform_3(%arg0: i32, %arg1: i32) -> (i32, i32) {
    %c0_i32 = arith.constant 0 : i32
    %c0_i32_0 = arith.constant 0 : i32
    %c0_i32_1 = arith.constant 0 : i32
    return %c0_i32, %c0_i32_0 : i32, i32
  }
  func.func @transform_4(%arg0: i32, %arg1: i32) -> (i32, i32, i32) {
    %c0_i32 = arith.constant 0 : i32
    %c0_i32_0 = arith.constant 0 : i32
    return %arg0, %c0_i32, %arg1 : i32, i32, i32
  }
}

</mosaic_0001>

<bundles_post_ra>
// kernel: mlpnet_forward.3
= control target key start
LH: loop header
LB: loop body
LE: loop exit
PB: predicated region body
PF: predicated region fallthrough
CT: control target
= control target key end

     0   :  { %s567_s12 = smov 0   ;;  %s569_s13 = smov 0   ;;  %s621_s0 = inlined_call_operand.vmem [shape: f32[2,4,128], index: 0, kind: input, shape index: {}]   ;;  %s622_s1 = inlined_call_operand.vmem [shape: bf16[32,4], index: 1, kind: input, shape index: {}]   ;;  %s623_s2 = inlined_call_operand.vmem [shape: f32[2,1,32,1], index: 2, kind: output, shape index: {0}]   ;;  %s624_s3 = inlined_call_operand.vmem [shape: f32[2,1,32,1], index: 3, kind: output, shape index: {1}]  }
   0x1   :  { %s571_s14 = smov 0  }
   0x2 LB: > { %s26_s15 = sadd.s32 1, %s541_s13  ;;  %p473_p0 = scmp.ge.s32.totalorder %s545_s14, 1  ;;  %s545_s14 = sphi %s571_s14, %s14_s14   ;;  %s541_s13 = sphi %s569_s13, %s626_s13   ;;  %s537_s12 = sphi %s567_s12, %s625_s12  }
   0x3   : > { %p28_p1 = scmp.ge.s32.totalorder %s26_s15, 2  ;;  %p160_p2 = scmp.lt.s32.totalorder %s545_s14, 3 }
   0x5   : > { %s628_s15 = smov (%p28_p1, %s26_s15), 0  ;;  %p161_p3 = pnand %p473_p0, %p160_p2 }
   0x6   : > { %p199_p4 = scmp.lt.s32.totalorder (!%p161_p3), %s537_s12, 1  ;;  %v521_v0 = vld [vmem:[%s622_s1] sm:$0xff] (!%p161_p3)   ;;  %vm241_vm0 = vcmask (!%p161_p3), 31744   ;;  %vm248_vm1 = vcmask (!%p161_p3), 1041408   ;;  %v522_v4 = vld [vmem:[%s622_s1 + $0x8] sm:$0xff] (!%p161_p3)   ;;  %vm309_vm2 = vcmask (!%p161_p3), 7168  }
   0x7   : > { %164 = sbr.rel (%p161_p3) target bundleno = 392 (0x188), region = 28  ;;  %492 = vmatprep.mubr.msk.bf16.mxu0 (!%p161_p3), %vm241_vm0, %v521_v0 }
   0xe   : > { %s630_s12 = smov (!%p199_p4, %s537_s12), 1 }
   0xf   : > { %s474_s18 = sshll.u32 %s630_s12, 2  ;;  %s485_s24 = sshll.u32 %s630_s12, 5 }
  0x10   : > { %s205_s21 = scalar_lea.vmem %s621_s0, %s474_s18  ;;  %s214_s27 = scalar_lea.vmem %s623_s2, %s485_s24 }
  0x11   : > { %v225_v1 = vld [vmem:[%s205_s21] sm:$0xf]  ;;  %s223_s30 = scalar_lea.vmem %s624_s3, %s485_s24 }
  0x12   : > { %v226_v2 = vpack.c.bf16 %v225_v1, %v225_v1 }
  0x14   : > { %496 = vmatprep.subr.msk.bf16.mxu0 %vm248_vm1, %v226_v2  ;;  %v250_v3 = vsel %vm248_vm1, %v226_v2, 0 }
  0x15   : > { %491 = vmatpush3.bf16.msra.mxu0 %v250_v3 }
  0x18   : > { %493 = vmatmul.mubr.msk.bf16.vlgmr.msra.gmra.mrb[0].mxu0 %vm241_vm0, %v522_v4 }
  0xeb   : > { %v494_v5 = vpop.f32.mrb[0].mxu0 }
  0xec   : > { %305 = vadd.xlane.f32.xlu1 %v494_v5  ;;  %v286_v6 = vpop.f32.mrb[1].mxu0  ;;  %v316_v12 = vmul.f32 %v494_v5, %v494_v5 }
  0xed   : > { %301 = vadd.xlane.f32.xlu0 %v286_v6  ;;  %v495_v7 = vpop.f32.mrb[2].mxu0  ;;  %v314_v10 = vmul.f32 %v286_v6, %v286_v6 }
  0xee   : > { %v289_v8 = vpop.f32.mrb[3].mxu0  ;;  %v317_v11 = vmul.f32 %v495_v7, %v495_v7 }
  0xef   : > { %v315_v9 = vmul.f32 %v289_v8, %v289_v8 }
  0xf0   : > { %307 = vadd.xlane.f32.xlu1 %v495_v7 }
  0xf1   : > { %303 = vadd.xlane.f32.xlu0 %v289_v8 }
  0xf4   : > { %320 = vadd.xlane.f32.xlu1 %v315_v9 }
  0xf5   : > { %318 = vadd.xlane.f32.xlu0 %v314_v10 }
  0xf8   : > { %324 = vadd.xlane.f32.xlu1 %v317_v11 }
  0xf9   : > { %322 = vadd.xlane.f32.xlu0 %v316_v12 }
 0x179   : > { %v306_v13 = vpop.xlane.xlu1 %305 }
 0x17a   : > { %312 = vst.msk [vmem:[%s214_s27 + $0x10] sm:$0xff] %vm309_vm2, %v306_v13  ;;  %v302_v14 = vpop.xlane.xlu0 %301 }
 0x17b   : > { %310 = vst.msk [vmem:[%s214_s27] sm:$0xff] %vm309_vm2, %v302_v14 }
 0x17d   : > { %v308_v15 = vpop.xlane.xlu1 %307 }
 0x17e   : > { %313 = vst.msk [vmem:[%s214_s27 + $0x18] sm:$0xff] %vm309_vm2, %v308_v15  ;;  %v304_v16 = vpop.xlane.xlu0 %303 }
 0x17f   : > { %311 = vst.msk [vmem:[%s214_s27 + $0x8] sm:$0xff] %vm309_vm2, %v304_v16 }
 0x181   : > { %v321_v17 = vpop.xlane.xlu1 %320 }
 0x182   : > { %327 = vst.msk [vmem:[%s223_s30 + $0x8] sm:$0xff] %vm309_vm2, %v321_v17  ;;  %v319_v18 = vpop.xlane.xlu0 %318 }
 0x183   : > { %326 = vst.msk [vmem:[%s223_s30] sm:$0xff] %vm309_vm2, %v319_v18 }
 0x185   : > { %v325_v19 = vpop.xlane.xlu1 %324 }
 0x186   : > { %329 = vst.msk [vmem:[%s223_s30 + $0x18] sm:$0xff] %vm309_vm2, %v325_v19  ;;  %v323_v20 = vpop.xlane.xlu0 %322 }
 0x187   : > { %328 = vst.msk [vmem:[%s223_s30 + $0x10] sm:$0xff] %vm309_vm2, %v323_v20 }
 0x188 PF: > { %s14_s14 = sadd.s32 1, %s545_s14   ;;  %s625_s12 = smov %s541_s13 }
 0x189   : > { %p11_p5 = scmp.ge.s32.totalorder %s14_s14, 4   ;;  %s626_s13 = smov %s628_s15 }
 0x18b   :  { %13 = sbr.rel (!%p11_p5) target bundleno = 2 (0x2), region = 70 }

// kernel: mlpnet_forward.4
= control target key start
LH: loop header
LB: loop body
LE: loop exit
PB: predicated region body
PF: predicated region fallthrough
CT: control target
= control target key end

     0   :  { %s1054_s24 = smov 0   ;;  %s1056_s25 = smov 0   ;;  %s1182_s0 = inlined_call_operand.vmem [shape: f32[2,4,128], index: 0, kind: input, shape index: {}]   ;;  %s1183_s1 = inlined_call_operand.vmem [shape: bf16[32,4], index: 1, kind: input, shape index: {}]   ;;  %s1184_s2 = inlined_call_operand.vmem [shape: f32[32,1], index: 2, kind: input, shape index: {}]   ;;  %s1185_s3 = inlined_call_operand.vmem [shape: f32[32,1], index: 3, kind: input, shape index: {}]   ;;  %s1186_s4 = inlined_call_operand.vmem [shape: bf16[64,32], index: 4, kind: input, shape index: {}]   ;;  %s1187_s5 = inlined_call_operand.vmem [shape: bf16[2,32,128], index: 5, kind: output, shape index: {0}]   ;;  %s1188_s6 = inlined_call_operand.vmem [shape: f32[2,1,64,1], index: 6, kind: output, shape index: {1}]   ;;  %s1189_s7 = inlined_call_operand.vmem [shape: f32[2,1,64,1], index: 7, kind: output, shape index: {2}]  }
   0x1   :  { %s1058_s26 = smov 0  }
   0x2 LB: > { %s30_s27 = sadd.s32 1, %s1007_s25  ;;  %p874_p0 = scmp.ge.s32.totalorder %s1011_s26, 1  ;;  %s1011_s26 = sphi %s1058_s26, %s18_s26   ;;  %s1007_s25 = sphi %s1056_s25, %s1193_s25   ;;  %s1003_s24 = sphi %s1054_s24, %s1192_s24  }
   0x3   : > { %p32_p1 = scmp.ge.s32.totalorder %s30_s27, 2  ;;  %p264_p2 = scmp.lt.s32.totalorder %s1011_s26, 3 }
   0x5   : > { %s1195_s27 = smov (%p32_p1, %s30_s27), 0  ;;  %p265_p3 = pnand %p874_p0, %p264_p2 }
   0x6   : > { %p319_p4 = scmp.lt.s32.totalorder (!%p265_p3), %s1003_s24, 1  ;;  %v983_v0 = vld [vmem:[%s1183_s1] sm:$0xff] (!%p265_p3)   ;;  %vm369_vm0 = vcmask (!%p265_p3), 31744   ;;  %v1013_v3 = vmov (!%p265_p3), 0   ;;  %vm376_vm1 = vcmask (!%p265_p3), 1041408   ;;  %v458_v4 = vld [vmem:[%s1185_s3 + $0x8] sm:$0xff] (!%p265_p3)  ;;  %v490_v22 = vlaneseq (!%p265_p3) }
   0x7   : > { %268 = sbr.rel (%p265_p3) target bundleno = 642 (0x282), region = 40  ;;  %v457_v1 = vld [vmem:[%s1185_s3] sm:$0xff] (!%p265_p3)  ;;  %935 = vmatprep.mubr.msk.bf16.mxu0 (!%p265_p3), %vm369_vm0, %v983_v0  ;;  %982 = vset.pattern.permute.xlu1 (!%p265_p3), %v1013_v3  ;;  %v430_v5 = vld [vmem:[%s1184_s2 + $0x8] sm:$0xff] (!%p265_p3)  ;;  %v432_v10 = vld [vmem:[%s1184_s2 + $0x18] sm:$0xff] (!%p265_p3)  ;;  %vm549_vm2 = vcmask (!%p265_p3), 261120   ;;  %vm643_vm5 = vcmask (!%p265_p3), 7168  }
   0x8   : > { %v429_v2 = vld [vmem:[%s1184_s2] sm:$0xff] (!%p265_p3)  ;;  %981 = vset.pattern.permute.xlu0 (!%p265_p3), %v1013_v3  ;;  %463 = vperm.xlu1 (!%p265_p3), %982, %v457_v1   ;;  %v984_v9 = vld [vmem:[%s1183_s1 + $0x8] sm:$0xff] (!%p265_p3)   ;;  %v431_v11 = vld [vmem:[%s1184_s2 + $0x10] sm:$0xff] (!%p265_p3)  ;;  %v491_v27 = vand.u32 (!%p265_p3), 127, %v490_v22 }
   0x9   : > { %435 = vperm.xlu0 (!%p265_p3), %981, %v429_v2   ;;  %v460_v12 = vld [vmem:[%s1185_s3 + $0x18] sm:$0xff] (!%p265_p3)  ;;  %v459_v13 = vld [vmem:[%s1185_s3 + $0x10] sm:$0xff] (!%p265_p3)  ;;  %v985_v14 = vld [vmem:[%s1186_s4] sm:$0xff] (!%p265_p3)  }
   0xa   : > { %v986_v15 = vld [vmem:[%s1186_s4 + $0x10] sm:$0xff] (!%p265_p3)   ;;  %vm494_vm3 = vcmp.lt.s32.totalorder (!%p265_p3), %v491_v27, 16  ;;  %v987_v51 = vld [vmem:[%s1186_s4 + $0x8] sm:$0xff] (!%p265_p3)   ;;  %v988_v52 = vld [vmem:[%s1186_s4 + $0x18] sm:$0xff] (!%p265_p3)  }
   0xb   : > { %947 = vmatprep.mubr.msk.bf16.mxu1 (!%p265_p3), %vm549_vm2, %v986_v15  ;;  %vm1122_vm4 = vmpackc.low (!%p265_p3), %vm494_vm3, %vm494_vm3 }
   0xc   : > { %468 = vperm.xlu1 (!%p265_p3), %982, %v458_v4  }
   0xd   : > { %440 = vperm.xlu0 (!%p265_p3), %981, %v430_v5  }
   0xe   : > { %s1197_s24 = smov (!%p319_p4, %s1003_s24), 1 }
   0xf   : > { %s875_s11 = sshll.u32 %s1197_s24, 2  ;;  %s906_s14 = sshll.u32 %s1197_s24, 4 }
  0x10   : > { %s325_s18 = scalar_lea.vmem %s1182_s0, %s875_s11  ;;  %450 = vperm.xlu1 %982, %v432_v10   ;;  %s333_s17 = scalar_lea.vmem %s1187_s5, %s906_s14 }
  0x11   : > { %v353_v6 = vld [vmem:[%s325_s18] sm:$0xf]  ;;  %445 = vperm.xlu0 %981, %v431_v11   ;;  %s907_s22 = sshll.u32 %s1197_s24, 6 }
  0x12   : > { %v354_v7 = vpack.c.bf16 %v353_v6, %v353_v6  ;;  %s342_s29 = scalar_lea.vmem %s1188_s6, %s907_s22  ;;  %s351_s24 = scalar_lea.vmem %s1189_s7, %s907_s22 }
  0x14   : > { %955 = vmatprep.subr.msk.bf16.mxu0 %vm376_vm1, %v354_v7  ;;  %v378_v8 = vsel %vm376_vm1, %v354_v7, 0  ;;  %478 = vperm.xlu1 %982, %v460_v12  }
  0x15   : > { %934 = vmatpush3.bf16.msra.mxu0 %v378_v8  ;;  %473 = vperm.xlu0 %981, %v459_v13  }
  0x18   : > { %936 = vmatmul.mubr.msk.bf16.vlgmr.msra.gmra.mrb[0].mxu0 %vm369_vm0, %v984_v9 }
  0x19   : > { %943 = vmatprep.mubr.msk.bf16.mxu0 %vm549_vm2, %v985_v14 }
  0x87   : > { %v464_v17 = vpop.permute.xlu1 %463 }
  0x88   : > { %v436_v16 = vpop.permute.xlu0 %435 }
  0x8b   : > { %v469_v19 = vpop.permute.xlu1 %468 }
  0x8c   : > { %v441_v18 = vpop.permute.xlu0 %440 }
  0x8f   : > { %v451_v21 = vpop.permute.xlu1 %450 }
  0x90   : > { %v446_v20 = vpop.permute.xlu0 %445 }
  0x93   : > { %v479_v33 = vpop.permute.xlu1 %478 }
  0x94   : > { %v474_v26 = vpop.permute.xlu0 %473 }
  0xeb   : > { %v937_v23 = vpop.f32.mrb[0].mxu0 }
  0xec   : > { %v455_v24 = vmul.f32 %v937_v23, %v446_v20  ;;  %v414_v25 = vpop.f32.mrb[1].mxu0 }
  0xed   : > { %v453_v28 = vmul.f32 %v436_v16, %v414_v25  ;;  %v938_v29 = vpop.f32.mrb[2].mxu0 }
  0xee   : > { %v483_v30 = vadd.f32 %v474_v26, %v455_v24  ;;  %v456_v31 = vmul.f32 %v938_v29, %v451_v21  ;;  %v417_v32 = vpop.f32.mrb[3].mxu0 }
  0xef   : > { %v481_v34 = vadd.f32 %v464_v17, %v453_v28  ;;  %v454_v35 = vmul.f32 %v441_v18, %v417_v32 }
  0xf0   : > { %v487_v36 = vmax.f32 %v483_v30, 0.0  ;;  %v484_v37 = vadd.f32 %v479_v33, %v456_v31 }
  0xf1   : > { %v485_v38 = vmax.f32 %v481_v34, 0.0  ;;  %v482_v39 = vadd.f32 %v469_v19, %v454_v35 }
  0xf2   : > { %v488_v40 = vmax.f32 %v484_v37, 0.0  ;;  %v499_v42 = vsel %vm494_vm3, %v487_v36, 0.0 }
  0xf3   : > { %v486_v41 = vmax.f32 %v482_v39, 0.0  ;;  %v497_v46 = vsel %vm494_vm3, %v485_v38, 0.0 }
  0xf4   : > { %v500_v43 = vsel %vm494_vm3, %v488_v40, 0.0  ;;  %v898_v44 = vpack.c.bf16 %v488_v40, %v487_v36 }
  0xf5   : > { %v921_v47 = vpack.c.bf16 %v500_v43, %v499_v42  ;;  %v498_v48 = vsel %vm494_vm3, %v486_v41, 0.0  ;;  %v895_v49 = vpack.c.bf16 %v486_v41, %v485_v38 }
  0xf6   : > { %v916_v50 = vpack.c.bf16 %v498_v48, %v497_v46 }
  0xf7   : > { %923 = vst [vmem:[%s333_s17 + $0x8] sm:$0xff] %v921_v47   ;;  %939 = vmatprep.subr.msk.bf16.mxu0 %vm1122_vm4, %v895_v49  ;;  %951 = vmatprep.subr.msk.bf16.mxu1 %vm1122_vm4, %v895_v49 }
  0xf8   : > { %917 = vst [vmem:[%s333_s17] sm:$0xff] %v916_v50   ;;  %940 = vmatpush3.bf16.msk.msra.mxu0 %vm1122_vm4, %v895_v49  ;;  %953 = vmatpush3.bf16.msk.msra.mxu1 %vm1122_vm4, %v895_v49 }
  0xf9   : > { %941 = vmatprep.subr.msk.bf16.mxu0 %vm1122_vm4, %v898_v44  ;;  %952 = vmatprep.subr.msk.bf16.mxu1 %vm1122_vm4, %v898_v44 }
  0xfc   : > { %942 = vmatpush3.bf16.msk.msra.mxu0 %vm1122_vm4, %v898_v44  ;;  %954 = vmatpush3.bf16.msk.msra.mxu1 %vm1122_vm4, %v898_v44 }
  0xff   : > { %944 = vmatmul.mubr.msk.bf16.vlgmr.msra.gmra.mrb[4].mxu0 %vm549_vm2, %v987_v51  ;;  %948 = vmatmul.mubr.msk.bf16.vlgmr.msra.gmra.mrb[0].mxu1 %vm549_vm2, %v988_v52 }
 0x1d2   : > { %v945_v53 = vpop.f32.mrb[4].mxu0  ;;  %v949_v54 = vpop.f32.mrb[0].mxu1 }
 0x1d3   : > { %639 = vadd.xlane.f32.xlu1 %v949_v54  ;;  %631 = vadd.xlane.f32.xlu0 %v945_v53  ;;  %v596_v55 = vpop.f32.mrb[5].mxu0  ;;  %v612_v56 = vpop.f32.mrb[1].mxu1  ;;  %v654_v61 = vmul.f32 %v945_v53, %v945_v53  ;;  %v658_v2 = vmul.f32 %v949_v54, %v949_v54 }
 0x1d4   : > { %v946_v57 = vpop.f32.mrb[6].mxu0  ;;  %v950_v58 = vpop.f32.mrb[2].mxu1  ;;  %v652_v62 = vmul.f32 %v596_v55, %v596_v55  ;;  %v656_v0 = vmul.f32 %v612_v56, %v612_v56 }
 0x1d5   : > { %v599_v59 = vpop.f32.mrb[7].mxu0  ;;  %v615_v60 = vpop.f32.mrb[3].mxu1  ;;  %v655_v63 = vmul.f32 %v946_v57, %v946_v57  ;;  %v659_v4 = vmul.f32 %v950_v58, %v950_v58 }
 0x1d6   : > { %v653_v1 = vmul.f32 %v599_v59, %v599_v59  ;;  %v657_v3 = vmul.f32 %v615_v60, %v615_v60 }
 0x1d7   : > { %635 = vadd.xlane.f32.xlu1 %v612_v56  ;;  %627 = vadd.xlane.f32.xlu0 %v596_v55 }
 0x1db   : > { %664 = vadd.xlane.f32.xlu1 %v654_v61  ;;  %633 = vadd.xlane.f32.xlu0 %v946_v57 }
 0x1df   : > { %641 = vadd.xlane.f32.xlu0 %v950_v58  ;;  %629 = vadd.xlane.f32.xlu1 %v599_v59 }
 0x1e3   : > { %637 = vadd.xlane.f32.xlu0 %v615_v60  ;;  %660 = vadd.xlane.f32.xlu1 %v652_v62 }
 0x1e7   : > { %666 = vadd.xlane.f32.xlu0 %v655_v63  ;;  %668 = vadd.xlane.f32.xlu1 %v656_v0 }
 0x1eb   : > { %672 = vadd.xlane.f32.xlu1 %v658_v2  ;;  %662 = vadd.xlane.f32.xlu0 %v653_v1 }
 0x1ef   : > { %670 = vadd.xlane.f32.xlu0 %v657_v3 }
 0x1f3   : > { %674 = vadd.xlane.f32.xlu0 %v659_v4 }
 0x260   : > { %v640_v5 = vpop.xlane.xlu1 %639  ;;  %v632_v6 = vpop.xlane.xlu0 %631 }
 0x261   : > { %650 = vst.msk [vmem:[%s342_s29 + $0x30] sm:$0xff] %vm643_vm5, %v640_v5  ;;  %646 = vst.msk [vmem:[%s342_s29 + $0x10] sm:$0xff] %vm643_vm5, %v632_v6 }
 0x264   : > { %v636_v7 = vpop.xlane.xlu1 %635  ;;  %v628_v8 = vpop.xlane.xlu0 %627 }
 0x265   : > { %648 = vst.msk [vmem:[%s342_s29 + $0x20] sm:$0xff] %vm643_vm5, %v636_v7  ;;  %644 = vst.msk [vmem:[%s342_s29] sm:$0xff] %vm643_vm5, %v628_v8 }
 0x268   : > { %v665_v9 = vpop.xlane.xlu1 %664  ;;  %v634_v10 = vpop.xlane.xlu0 %633 }
 0x269   : > { %678 = vst.msk [vmem:[%s351_s24 + $0x10] sm:$0xff] %vm643_vm5, %v665_v9  ;;  %647 = vst.msk [vmem:[%s342_s29 + $0x18] sm:$0xff] %vm643_vm5, %v634_v10 }
 0x26c   : > { %v642_v11 = vpop.xlane.xlu0 %641  ;;  %v630_v12 = vpop.xlane.xlu1 %629 }
 0x26d   : > { %651 = vst.msk [vmem:[%s342_s29 + $0x38] sm:$0xff] %vm643_vm5, %v642_v11  ;;  %645 = vst.msk [vmem:[%s342_s29 + $0x8] sm:$0xff] %vm643_vm5, %v630_v12 }
 0x270   : > { %v638_v13 = vpop.xlane.xlu0 %637  ;;  %v661_v14 = vpop.xlane.xlu1 %660 }
 0x271   : > { %649 = vst.msk [vmem:[%s342_s29 + $0x28] sm:$0xff] %vm643_vm5, %v638_v13  ;;  %676 = vst.msk [vmem:[%s351_s24] sm:$0xff] %vm643_vm5, %v661_v14 }
 0x274   : > { %v667_v15 = vpop.xlane.xlu0 %666  ;;  %v669_v16 = vpop.xlane.xlu1 %668 }
 0x275   : > { %679 = vst.msk [vmem:[%s351_s24 + $0x18] sm:$0xff] %vm643_vm5, %v667_v15  ;;  %680 = vst.msk [vmem:[%s351_s24 + $0x20] sm:$0xff] %vm643_vm5, %v669_v16 }
 0x278   : > { %v673_v17 = vpop.xlane.xlu1 %672  ;;  %v663_v18 = vpop.xlane.xlu0 %662 }
 0x279   : > { %682 = vst.msk [vmem:[%s351_s24 + $0x30] sm:$0xff] %vm643_vm5, %v673_v17  ;;  %677 = vst.msk [vmem:[%s351_s24 + $0x8] sm:$0xff] %vm643_vm5, %v663_v18 }
 0x27c   : > { %v671_v19 = vpop.xlane.xlu0 %670 }
 0x27d   : > { %681 = vst.msk [vmem:[%s351_s24 + $0x28] sm:$0xff] %vm643_vm5, %v671_v19 }
 0x280   : > { %v675_v20 = vpop.xlane.xlu0 %674 }
 0x281   : > { %683 = vst.msk [vmem:[%s351_s24 + $0x38] sm:$0xff] %vm643_vm5, %v675_v20 }
 0x282 PF: > { %s18_s26 = sadd.s32 1, %s1011_s26   ;;  %s1192_s24 = smov %s1007_s25 }
 0x283   : > { %p15_p5 = scmp.ge.s32.totalorder %s18_s26, 4   ;;  %s1193_s25 = smov %s1195_s27 }
 0x285   :  { %17 = sbr.rel (!%p15_p5) target bundleno = 2 (0x2), region = 94 }

// kernel: mlpnet_forward.5
= control target key start
LH: loop header
LB: loop body
LE: loop exit
PB: predicated region body
PF: predicated region fallthrough
CT: control target
= control target key end

     0   :  { %s691_s15 = smov 0   ;;  %s693_s16 = smov 0   ;;  %s792_s0 = inlined_call_operand.vmem [shape: bf16[2,32,128], index: 0, kind: input, shape index: {}]   ;;  %s793_s1 = inlined_call_operand.vmem [shape: bf16[64,32], index: 1, kind: input, shape index: {}]   ;;  %s794_s2 = inlined_call_operand.vmem [shape: f32[64,1], index: 2, kind: input, shape index: {}]   ;;  %s795_s3 = inlined_call_operand.vmem [shape: f32[64,1], index: 3, kind: input, shape index: {}]   ;;  %s796_s4 = inlined_call_operand.vmem [shape: f32[2,64,128], index: 4, kind: output, shape index: {}]  }
   0x1   :  { %s695_s17 = smov 0  }
   0x2 LB: > { %s26_s18 = sadd.s32 1, %s659_s16  ;;  %p567_p0 = scmp.ge.s32.totalorder %s663_s17, 1  ;;  %s663_s17 = sphi %s695_s17, %s14_s17   ;;  %s659_s16 = sphi %s693_s16, %s798_s16   ;;  %s655_s15 = sphi %s691_s15, %s797_s15  }
   0x3   : > { %p28_p1 = scmp.ge.s32.totalorder %s26_s18, 2  ;;  %p181_p2 = scmp.lt.s32.totalorder %s663_s17, 3 }
   0x5   : > { %s800_s18 = smov (%p28_p1, %s26_s18), 0  ;;  %p182_p3 = pnand %p567_p0, %p181_p2 }
   0x6   : > { %p213_p4 = scmp.lt.s32.totalorder (!%p182_p3), %s655_s15, 1  ;;  %v637_v0 = vld [vmem:[%s793_s1] sm:$0xff] (!%p182_p3)   ;;  %vm274_vm0 = vcmask (!%p182_p3), 261120   ;;  %v638_v1 = vld [vmem:[%s793_s1 + $0x10] sm:$0xff] (!%p182_p3)   ;;  %v665_v2 = vmov (!%p182_p3), 0   ;;  %v355_v7 = vld [vmem:[%s794_s2 + $0x18] sm:$0xff] (!%p182_p3) }
   0x7   : > { %185 = sbr.rel (%p182_p3) target bundleno = 248 (0xf8), region = 36  ;;  %596 = vmatprep.mubr.msk.bf16.mxu0 (!%p182_p3), %vm274_vm0, %v637_v0  ;;  %600 = vmatprep.mubr.msk.bf16.mxu1 (!%p182_p3), %vm274_vm0, %v638_v1  ;;  %v354_v3 = vld [vmem:[%s794_s2 + $0x10] sm:$0xff] (!%p182_p3)  ;;  %v352_v4 = vld [vmem:[%s794_s2] sm:$0xff] (!%p182_p3)  ;;  %v353_v8 = vld [vmem:[%s794_s2 + $0x8] sm:$0xff] (!%p182_p3) }
   0x8   : > { %634 = vset.pattern.permute.xlu1 (!%p182_p3), %v665_v2  ;;  %633 = vset.pattern.permute.xlu0 (!%p182_p3), %v665_v2  ;;  %v639_v9 = vld [vmem:[%s793_s1 + $0x8] sm:$0xff] (!%p182_p3)   ;;  %v640_v10 = vld [vmem:[%s793_s1 + $0x18] sm:$0xff] (!%p182_p3)   ;;  %v356_v12 = vld [vmem:[%s794_s2 + $0x20] sm:$0xff] (!%p182_p3) }
   0x9   : > { %372 = vperm.xlu1 (!%p182_p3), %634, %v354_v3   ;;  %362 = vperm.xlu0 (!%p182_p3), %633, %v352_v4   ;;  %v357_v11 = vld [vmem:[%s794_s2 + $0x28] sm:$0xff] (!%p182_p3)  ;;  %v359_v13 = vld [vmem:[%s794_s2 + $0x38] sm:$0xff] (!%p182_p3)  ;;  %v358_v14 = vld [vmem:[%s794_s2 + $0x30] sm:$0xff] (!%p182_p3) }
   0xa   : > { %v409_v15 = vld [vmem:[%s795_s3 + $0x8] sm:$0xff] (!%p182_p3)  ;;  %v408_v16 = vld [vmem:[%s795_s3] sm:$0xff] (!%p182_p3)  ;;  %v411_v17 = vld [vmem:[%s795_s3 + $0x18] sm:$0xff] (!%p182_p3) }
   0xb   : > { %v410_v18 = vld [vmem:[%s795_s3 + $0x10] sm:$0xff] (!%p182_p3)  ;;  %v413_v19 = vld [vmem:[%s795_s3 + $0x28] sm:$0xff] (!%p182_p3)  ;;  %v412_v20 = vld [vmem:[%s795_s3 + $0x20] sm:$0xff] (!%p182_p3) }
   0xc   : > { %v415_v21 = vld [vmem:[%s795_s3 + $0x38] sm:$0xff] (!%p182_p3)  ;;  %v414_v22 = vld [vmem:[%s795_s3 + $0x30] sm:$0xff] (!%p182_p3) }
   0xd   : > { %377 = vperm.xlu1 (!%p182_p3), %634, %v355_v7   ;;  %367 = vperm.xlu0 (!%p182_p3), %633, %v353_v8  }
   0xe   : > { %s802_s15 = smov (!%p213_p4, %s655_s15), 1 }
   0xf   : > { %s584_s23 = sshll.u32 %s802_s15, 4  ;;  %s585_s19 = sshll.u32 %s802_s15, 6 }
  0x10   : > { %s220_s30 = scalar_lea.vmem %s792_s0, %s584_s23  ;;  %s228_s22 = scalar_lea.vmem %s796_s4, %s585_s19 }
  0x11   : > { %v635_v5 = vld [vmem:[%s220_s30] sm:$0xff]   ;;  %v636_v6 = vld [vmem:[%s220_s30 + $0x8] sm:$0xff]   ;;  %387 = vperm.xlu1 %634, %v357_v11   ;;  %382 = vperm.xlu0 %633, %v356_v12  }
  0x12   : > { %592 = vmatprep.subr.bf16.mxu0 %v635_v5  ;;  %604 = vmatprep.subr.bf16.mxu1 %v635_v5 }
  0x13   : > { %593 = vmatpush3.bf16.msra.mxu0 %v635_v5  ;;  %606 = vmatpush3.bf16.msra.mxu1 %v635_v5 }
  0x14   : > { %594 = vmatprep.subr.bf16.mxu0 %v636_v6  ;;  %605 = vmatprep.subr.bf16.mxu1 %v636_v6 }
  0x15   : > { %397 = vperm.xlu1 %634, %v359_v13   ;;  %392 = vperm.xlu0 %633, %v358_v14  }
  0x17   : > { %595 = vmatpush3.bf16.msra.mxu0 %v636_v6  ;;  %607 = vmatpush3.bf16.msra.mxu1 %v636_v6 }
  0x19   : > { %423 = vperm.xlu1 %634, %v409_v15   ;;  %418 = vperm.xlu0 %633, %v408_v16  }
  0x1a   : > { %597 = vmatmul.mubr.msk.bf16.vlgmr.msra.gmra.mrb[0].mxu0 %vm274_vm0, %v639_v9  ;;  %601 = vmatmul.mubr.msk.bf16.vlgmr.msra.gmra.mrb[0].mxu1 %vm274_vm0, %v640_v10 }
  0x1d   : > { %433 = vperm.xlu1 %634, %v411_v17   ;;  %428 = vperm.xlu0 %633, %v410_v18  }
  0x21   : > { %443 = vperm.xlu1 %634, %v413_v19   ;;  %438 = vperm.xlu0 %633, %v412_v20  }
  0x25   : > { %453 = vperm.xlu1 %634, %v415_v21   ;;  %448 = vperm.xlu0 %633, %v414_v22  }
  0x88   : > { %v363_v23 = vpop.permute.xlu0 %362  ;;  %v373_v24 = vpop.permute.xlu1 %372 }
  0x8c   : > { %v368_v25 = vpop.permute.xlu0 %367  ;;  %v378_v26 = vpop.permute.xlu1 %377 }
  0x90   : > { %v383_v27 = vpop.permute.xlu0 %382  ;;  %v388_v28 = vpop.permute.xlu1 %387 }
  0x94   : > { %v393_v29 = vpop.permute.xlu0 %392  ;;  %v398_v30 = vpop.permute.xlu1 %397 }
  0x98   : > { %v419_v31 = vpop.permute.xlu0 %418  ;;  %v424_v32 = vpop.permute.xlu1 %423 }
  0x9c   : > { %v429_v33 = vpop.permute.xlu0 %428  ;;  %v434_v34 = vpop.permute.xlu1 %433 }
  0xa0   : > { %v439_v35 = vpop.permute.xlu0 %438  ;;  %v444_v36 = vpop.permute.xlu1 %443 }
  0xa4   : > { %v449_v37 = vpop.permute.xlu0 %448  ;;  %v454_v54 = vpop.permute.xlu1 %453 }
  0xed   : > { %v598_v38 = vpop.f32.mrb[0].mxu0  ;;  %v602_v39 = vpop.f32.mrb[0].mxu1 }
  0xee   : > { %v402_v40 = vmul.f32 %v598_v38, %v373_v24  ;;  %v406_v41 = vmul.f32 %v602_v39, %v393_v29  ;;  %v321_v42 = vpop.f32.mrb[1].mxu0  ;;  %v337_v43 = vpop.f32.mrb[1].mxu1 }
  0xef   : > { %v400_v44 = vmul.f32 %v363_v23, %v321_v42  ;;  %v404_v45 = vmul.f32 %v383_v27, %v337_v43  ;;  %v599_v46 = vpop.f32.mrb[2].mxu0  ;;  %v603_v47 = vpop.f32.mrb[2].mxu1 }
  0xf0   : > { %v458_v48 = vadd.f32 %v429_v33, %v402_v40  ;;  %v462_v49 = vadd.f32 %v449_v37, %v406_v41  ;;  %v403_v50 = vmul.f32 %v599_v46, %v378_v26  ;;  %v407_v51 = vmul.f32 %v603_v47, %v398_v30  ;;  %v324_v52 = vpop.f32.mrb[3].mxu0  ;;  %v340_v53 = vpop.f32.mrb[3].mxu1 }
  0xf1   : > { %v456_v55 = vadd.f32 %v419_v31, %v400_v44  ;;  %v460_v56 = vadd.f32 %v439_v35, %v404_v45  ;;  %v401_v57 = vmul.f32 %v368_v25, %v324_v52  ;;  %v405_v58 = vmul.f32 %v388_v28, %v340_v53 }
  0xf2   : > { %v466_v59 = vmax.f32 %v458_v48, 0.0  ;;  %v470_v60 = vmax.f32 %v462_v49, 0.0  ;;  %v459_v61 = vadd.f32 %v434_v34, %v403_v50  ;;  %v463_v62 = vadd.f32 %v454_v54, %v407_v51 }
  0xf3   : > { %v464_v63 = vmax.f32 %v456_v55, 0.0  ;;  %v468_v0 = vmax.f32 %v460_v56, 0.0  ;;  %v457_v1 = vadd.f32 %v424_v32, %v401_v57  ;;  %v461_v2 = vadd.f32 %v444_v36, %v405_v58 }
  0xf4   : > { %474 = vst [vmem:[%s228_s22 + $0x10] sm:$0xff] %v466_v59  ;;  %478 = vst [vmem:[%s228_s22 + $0x30] sm:$0xff] %v470_v60  ;;  %v467_v3 = vmax.f32 %v459_v61, 0.0  ;;  %v471_v4 = vmax.f32 %v463_v62, 0.0 }
  0xf5   : > { %472 = vst [vmem:[%s228_s22] sm:$0xff] %v464_v63  ;;  %476 = vst [vmem:[%s228_s22 + $0x20] sm:$0xff] %v468_v0  ;;  %v465_v5 = vmax.f32 %v457_v1, 0.0  ;;  %v469_v6 = vmax.f32 %v461_v2, 0.0 }
  0xf6   : > { %475 = vst [vmem:[%s228_s22 + $0x18] sm:$0xff] %v467_v3  ;;  %479 = vst [vmem:[%s228_s22 + $0x38] sm:$0xff] %v471_v4 }
  0xf7   : > { %473 = vst [vmem:[%s228_s22 + $0x8] sm:$0xff] %v465_v5  ;;  %477 = vst [vmem:[%s228_s22 + $0x28] sm:$0xff] %v469_v6 }
  0xf8 PF: > { %s14_s17 = sadd.s32 1, %s663_s17   ;;  %s797_s15 = smov %s659_s16 }
  0xf9   : > { %p11_p5 = scmp.ge.s32.totalorder %s14_s17, 4   ;;  %s798_s16 = smov %s800_s18 }
  0xfb   :  { %13 = sbr.rel (!%p11_p5) target bundleno = 2 (0x2), region = 66 }

</bundles_post_ra>
